<compile_context>
chip_gen: v5e
topology: v5e:2x2
jax: 0.10.0
libtpu: 0.0.40
codegen_flags: <defaults>
</compile_context>

<pallas_src>
import jax
import jax.numpy as jnp
from jax.experimental import pallas as pl
from jax.experimental.pallas import tpu as pltpu

# MONAI DiceLoss defaults
_SMOOTH_NR = 1e-5
_SMOOTH_DR = 1e-5


def _round_up(x, m):
    return (x + m - 1) // m * m


def _choose_lane_tile(nc, hw_pad, in_itemsize):
    # VMEM budget: 2 inputs x 2 pipeline buffers + 3 f32 accumulators,
    # kept well under the 32 MiB scoped limit (valid on v5e/v6e/v7x).
    budget = 16 * 1024 * 1024
    bytes_per_lane = nc * (2 * 2 * in_itemsize + 3 * 4)
    tile = (budget // max(bytes_per_lane, 1)) // 128 * 128
    return max(128, min(tile, 16384, hw_pad))


def _make_kernel(hw, lane_tile, tiles_per_split, needs_mask):
    def kernel(pred_ref, true_ref, out_ref, inter_acc, den_acc, bce_acc):
        t = pl.program_id(1)

        @pl.when(t == 0)
        def _init():
            inter_acc[...] = jnp.zeros_like(inter_acc)
            den_acc[...] = jnp.zeros_like(den_acc)
            bce_acc[...] = jnp.zeros_like(bce_acc)

        x = pred_ref[...].astype(jnp.float32)   # logits (f32 accumulation)
        y = true_ref[...].astype(jnp.float32)   # targets

        # Shared transcendental work between sigmoid and stable BCE.
        e = jnp.exp(-jnp.abs(x))                # EUP, reused twice
        inv = 1.0 / (1.0 + e)
        p = jnp.where(x >= 0.0, inv, e * inv)   # sigmoid(x), stable
        bce = jnp.maximum(x, 0.0) - x * y + jnp.log1p(e)

        inter_c = y * p
        den_c = y + p                           # fused dice denominator (one reduce)

        if needs_mask:
            # Mask lanes past the true spatial extent (padding / dead tiles).
            s = pl.program_id(0)
            tile_idx = s * tiles_per_split + t
            lane = jax.lax.broadcasted_iota(jnp.int32, x.shape, 1)
            valid = tile_idx * lane_tile + lane < hw
            inter_c = jnp.where(valid, inter_c, 0.0)
            den_c = jnp.where(valid, den_c, 0.0)
            bce = jnp.where(valid, bce, 0.0)

        # Elementwise (VPU-only) accumulation; cross-lane reduce deferred.
        inter_acc[...] += inter_c
        den_acc[...] += den_c
        bce_acc[...] += bce

        @pl.when(t == pl.num_programs(1) - 1)
        def _finalize():
            out_ref[0, :, 0:1] = jnp.sum(inter_acc[...], axis=1, keepdims=True)
            out_ref[0, :, 1:2] = jnp.sum(den_acc[...], axis=1, keepdims=True)
            out_ref[0, :, 2:3] = jnp.sum(bce_acc[...], axis=1, keepdims=True)

    return kernel


def dice_cross_entropy_loss(y_pred, y_true, *, lane_tile=None, num_splits=2):
    """MONAI DiceLoss(sigmoid=True) + BCEWithLogitsLoss for NCHW logits/targets."""
    n, c, h, w = y_pred.shape
    nc, hw = n * c, h * w
    pred2d = y_pred.reshape(nc, hw)     # native dtype; cast happens in-kernel
    true2d = y_true.reshape(nc, hw)

    # Pad the lane axis to a multiple of 128 (in-kernel mask keeps sums exact).
    hw_pad = _round_up(hw, 128)
    if hw_pad != hw:
        pred2d = jnp.pad(pred2d, ((0, 0), (0, hw_pad - hw)))
        true2d = jnp.pad(true2d, ((0, 0), (0, hw_pad - hw)))

    in_itemsize = max(jnp.dtype(y_pred.dtype).itemsize,
                      jnp.dtype(y_true.dtype).itemsize)
    if lane_tile is None:
        lane_tile = _choose_lane_tile(nc, hw_pad, in_itemsize)
    lane_tile = min(_round_up(lane_tile, 128), hw_pad)

    num_tiles = (hw_pad + lane_tile - 1) // lane_tile
    num_splits = max(1, min(num_splits, num_tiles))       # v7x: 2 TCs; else 1
    tiles_per_split = (num_tiles + num_splits - 1) // num_splits
    needs_mask = (num_splits * tiles_per_split * lane_tile) != hw

    def in_map(s, t):
        # Clamp dead trailing tiles of the last split onto a valid block; the
        # in-kernel mask zeroes their contribution.
        tile = jnp.minimum(s * tiles_per_split + t, num_tiles - 1)
        return (0, tile)

    kernel = _make_kernel(hw, lane_tile, tiles_per_split, needs_mask)

    partials = pl.pallas_call(
        kernel,
        out_shape=jax.ShapeDtypeStruct((num_splits, nc, 3), jnp.float32),
        grid_spec=pltpu.PrefetchScalarGridSpec(
            num_scalar_prefetch=0,
            grid=(num_splits, tiles_per_split),
            in_specs=[
                pl.BlockSpec((nc, lane_tile), in_map),
                pl.BlockSpec((nc, lane_tile), in_map),
            ],
            out_specs=pl.BlockSpec((1, nc, 3), lambda s, t: (s, 0, 0)),
            scratch_shapes=[
                pltpu.VMEM((nc, lane_tile), jnp.float32),   # intersection acc
                pltpu.VMEM((nc, lane_tile), jnp.float32),   # y + p acc
                pltpu.VMEM((nc, lane_tile), jnp.float32),   # bce acc
            ],
        ),
        compiler_params=pltpu.CompilerParams(
            dimension_semantics=("parallel", "arbitrary"),
            vmem_limit_bytes=32 * 1024 * 1024,
        ),
        cost_estimate=pl.CostEstimate(
            flops=10 * nc * hw,
            transcendentals=3 * nc * hw,
            bytes_accessed=(pred2d.size * pred2d.dtype.itemsize
                            + true2d.size * true2d.dtype.itemsize
                            + num_splits * nc * 3 * 4),
        ),
    )(pred2d, true2d)

    # Tiny epilogue: combine per-split partial sums and form the two means.
    totals = jnp.sum(partials, axis=0)            # (nc, 3)
    intersection = totals[:, 0]
    denom = totals[:, 1]
    bce_sum = totals[:, 2]
    dice = 1.0 - (2.0 * intersection + _SMOOTH_NR) / (denom + _SMOOTH_DR)
    dice_loss = jnp.mean(dice)                    # mean over N*C rows
    bce_loss = jnp.sum(bce_sum) / (nc * hw)       # mean over true N*C*H*W count
    return dice_loss + bce_loss


def _reference(y_pred, y_true):
    x = y_pred.astype(jnp.float32)
    y = y_true.astype(jnp.float32)
    p = jax.nn.sigmoid(x)
    inter = jnp.sum(y * p, axis=(2, 3))
    den = jnp.sum(y, axis=(2, 3)) + jnp.sum(p, axis=(2, 3))
    dice = jnp.mean(1.0 - (2.0 * inter + _SMOOTH_NR) / (den + _SMOOTH_DR))
    bce = jnp.mean(jnp.maximum(x, 0.0) - x * y + jnp.log1p(jnp.exp(-jnp.abs(x))))
    return dice + bce


if __name__ == "__main__":
    key = jax.random.PRNGKey(0)
    k1, k2, k3, k4 = jax.random.split(key, 4)

    # Case 1: f32 logits, forced small lane tile -> multi-tile grid + 2-way split.
    N, C, H, W = 2, 4, 16, 16
    y_pred = jax.random.normal(k1, (N, C, H, W), dtype=jnp.float32)
    y_true = jax.random.bernoulli(k2, p=0.3, shape=(N, C, H, W)).astype(jnp.float32)
    loss = dice_cross_entropy_loss(y_pred, y_true, lane_tile=128)
    jax.block_until_ready(loss)
    ref = _reference(y_pred, y_true)
    assert jnp.allclose(loss, ref, rtol=1e-5, atol=1e-5), (loss, ref)

    # Case 2: bf16 logits/mask, ragged spatial extent -> exercises padding mask.
    N2, C2, H2, W2 = 2, 3, 10, 10
    y_pred2 = jax.random.normal(k3, (N2, C2, H2, W2), dtype=jnp.bfloat16)
    y_true2 = jax.random.bernoulli(k4, p=0.4, shape=(N2, C2, H2, W2)).astype(jnp.bfloat16)
    loss2 = dice_cross_entropy_loss(y_pred2, y_true2)
    jax.block_until_ready(loss2)
    ref2 = _reference(y_pred2, y_true2)
    assert jnp.allclose(loss2, ref2, rtol=1e-4, atol=1e-4), (loss2, ref2)

    print("KERNEL_OK")
</pallas_src>

<mosaic_0001>
module attributes {stable_mosaic.version = 11 : i64} {
  func.func @kernel(%arg0: i32, %arg1: i32, %arg2: memref<8x128xf32, #tpu.memory_space<vmem>>, %arg3: memref<8x128xf32, #tpu.memory_space<vmem>>, %arg4: memref<1x8x3xf32, #tpu.memory_space<vmem>>, %arg5: memref<8x128xf32, #tpu.memory_space<vmem>>, %arg6: memref<8x128xf32, #tpu.memory_space<vmem>>, %arg7: memref<8x128xf32, #tpu.memory_space<vmem>>) attributes {dimension_semantics = [#tpu.dimension_semantics<parallel>, #tpu.dimension_semantics<arbitrary>], iteration_bounds = array<i64: 2, 1>, scalar_prefetch = 0 : i64, scratch_operands = 3 : i64, tpu.core_type = #tpu.core_type<tc>, window_params = [{transform_indices = @transform_0, window_bounds = array<i64: 8, 128>}, {transform_indices = @transform_1, window_bounds = array<i64: 8, 128>}, {transform_indices = @transform_2, window_bounds = array<i64: 1, 8, 3>}]} {
    %c0_i32 = arith.constant 0 : i32
    %0 = arith.cmpi eq, %arg1, %c0_i32 : i32
    %1 = arith.extui %0 : i1 to i32
    %c0_i32_0 = arith.constant 0 : i32
    %2 = arith.cmpi ne, %1, %c0_i32_0 : i32
    scf.if %2 {
      %cst_22 = arith.constant 0.000000e+00 : f32
      %37 = vector.broadcast %cst_22 : f32 to vector<8x128xf32>
      %c0_23 = arith.constant 0 : index
      %c0_24 = arith.constant 0 : index
      %38 = vector.load %arg5[%c0_23, %c0_24] : memref<8x128xf32, #tpu.memory_space<vmem>>, vector<8x128xf32>
      tpu.vector_store %arg5[%c0_23, %c0_24], %37 {strides = array<i32>} : memref<8x128xf32, #tpu.memory_space<vmem>>, vector<8x128xf32>,
      %cst_25 = arith.constant 0.000000e+00 : f32
      %39 = vector.broadcast %cst_25 : f32 to vector<8x128xf32>
      %c0_26 = arith.constant 0 : index
      %c0_27 = arith.constant 0 : index
      %40 = vector.load %arg6[%c0_26, %c0_27] : memref<8x128xf32, #tpu.memory_space<vmem>>, vector<8x128xf32>
      tpu.vector_store %arg6[%c0_26, %c0_27], %39 {strides = array<i32>} : memref<8x128xf32, #tpu.memory_space<vmem>>, vector<8x128xf32>,
      %cst_28 = arith.constant 0.000000e+00 : f32
      %41 = vector.broadcast %cst_28 : f32 to vector<8x128xf32>
      %c0_29 = arith.constant 0 : index
      %c0_30 = arith.constant 0 : index
      %42 = vector.load %arg7[%c0_29, %c0_30] : memref<8x128xf32, #tpu.memory_space<vmem>>, vector<8x128xf32>
      tpu.vector_store %arg7[%c0_29, %c0_30], %41 {strides = array<i32>} : memref<8x128xf32, #tpu.memory_space<vmem>>, vector<8x128xf32>,
    } else {
    }
    %c0 = arith.constant 0 : index
    %c0_1 = arith.constant 0 : index
    %3 = vector.load %arg2[%c0, %c0_1] : memref<8x128xf32, #tpu.memory_space<vmem>>, vector<8x128xf32>
    %c0_2 = arith.constant 0 : index
    %c0_3 = arith.constant 0 : index
    %4 = vector.load %arg3[%c0_2, %c0_3] : memref<8x128xf32, #tpu.memory_space<vmem>>, vector<8x128xf32>
    %5 = math.absf %3 : vector<8x128xf32>
    %cst = arith.constant 0.000000e+00 : f32
    %6 = vector.broadcast %cst : f32 to vector<8x128xf32>
    %7 = arith.subf %6, %5 : vector<8x128xf32>
    %8 = math.exp %7 : vector<8x128xf32>
    %cst_4 = arith.constant 1.000000e+00 : f32
    %9 = vector.broadcast %cst_4 : f32 to vector<8x128xf32>
    %10 = arith.addf %9, %8 : vector<8x128xf32>
    %cst_5 = arith.constant 1.000000e+00 : f32
    %11 = vector.broadcast %cst_5 : f32 to vector<8x128xf32>
    %12 = arith.divf %11, %10 : vector<8x128xf32>
    %cst_6 = arith.constant 0.000000e+00 : f32
    %13 = vector.broadcast %cst_6 : f32 to vector<8x128xf32>
    %14 = arith.cmpf oge, %3, %13 : vector<8x128xf32>
    %15 = arith.mulf %8, %12 : vector<8x128xf32>
    %16 = arith.select %14, %12, %15 : vector<8x128xi1>, vector<8x128xf32>
    %cst_7 = arith.constant 0.000000e+00 : f32
    %17 = vector.broadcast %cst_7 : f32 to vector<8x128xf32>
    %18 = arith.maximumf %3, %17 : vector<8x128xf32>
    %19 = arith.mulf %3, %4 : vector<8x128xf32>
    %20 = arith.subf %18, %19 : vector<8x128xf32>
    %21 = math.log1p %8 : vector<8x128xf32>
    %22 = arith.addf %20, %21 : vector<8x128xf32>
    %23 = arith.mulf %4, %16 : vector<8x128xf32>
    %24 = arith.addf %4, %16 : vector<8x128xf32>
    %c0_8 = arith.constant 0 : index
    %c0_9 = arith.constant 0 : index
    %25 = vector.load %arg5[%c0_8, %c0_9] : memref<8x128xf32, #tpu.memory_space<vmem>>, vector<8x128xf32>
    %26 = arith.addf %25, %23 : vector<8x128xf32>
    %c0_10 = arith.constant 0 : index
    %c0_11 = arith.constant 0 : index
    %27 = vector.load %arg5[%c0_10, %c0_11] : memref<8x128xf32, #tpu.memory_space<vmem>>, vector<8x128xf32>
    tpu.vector_store %arg5[%c0_10, %c0_11], %26 {strides = array<i32>} : memref<8x128xf32, #tpu.memory_space<vmem>>, vector<8x128xf32>,
    %c0_12 = arith.constant 0 : index
    %c0_13 = arith.constant 0 : index
    %28 = vector.load %arg6[%c0_12, %c0_13] : memref<8x128xf32, #tpu.memory_space<vmem>>, vector<8x128xf32>
    %29 = arith.addf %28, %24 : vector<8x128xf32>
    %c0_14 = arith.constant 0 : index
    %c0_15 = arith.constant 0 : index
    %30 = vector.load %arg6[%c0_14, %c0_15] : memref<8x128xf32, #tpu.memory_space<vmem>>, vector<8x128xf32>
    tpu.vector_store %arg6[%c0_14, %c0_15], %29 {strides = array<i32>} : memref<8x128xf32, #tpu.memory_space<vmem>>, vector<8x128xf32>,
    %c0_16 = arith.constant 0 : index
    %c0_17 = arith.constant 0 : index
    %31 = vector.load %arg7[%c0_16, %c0_17] : memref<8x128xf32, #tpu.memory_space<vmem>>, vector<8x128xf32>
    %32 = arith.addf %31, %22 : vector<8x128xf32>
    %c0_18 = arith.constant 0 : index
    %c0_19 = arith.constant 0 : index
    %33 = vector.load %arg7[%c0_18, %c0_19] : memref<8x128xf32, #tpu.memory_space<vmem>>, vector<8x128xf32>
    tpu.vector_store %arg7[%c0_18, %c0_19], %32 {strides = array<i32>} : memref<8x128xf32, #tpu.memory_space<vmem>>, vector<8x128xf32>,
    %c0_i32_20 = arith.constant 0 : i32
    %34 = arith.cmpi eq, %arg1, %c0_i32_20 : i32
    %35 = arith.extui %34 : i1 to i32
    %c0_i32_21 = arith.constant 0 : i32
    %36 = arith.cmpi ne, %35, %c0_i32_21 : i32
    scf.if %36 {
      %c0_22 = arith.constant 0 : index
      %c0_23 = arith.constant 0 : index
      %37 = vector.load %arg5[%c0_22, %c0_23] : memref<8x128xf32, #tpu.memory_space<vmem>>, vector<8x128xf32>
      %cst_24 = arith.constant dense<0.000000e+00> : vector<8xf32>
      %38 = vector.multi_reduction <add>, %37, %cst_24 [1] : vector<8x128xf32> to vector<8xf32>
      %39 = vector.shape_cast %38 : vector<8xf32> to vector<8x1xf32>
      %c0_25 = arith.constant 0 : index
      %c0_26 = arith.constant 0 : index
      %c0_27 = arith.constant 0 : index
      %40 = vector.load %arg4[%c0_25, %c0_26, %c0_27] : memref<1x8x3xf32, #tpu.memory_space<vmem>>, vector<1x8x1xf32>
      %41 = vector.shape_cast %40 : vector<1x8x1xf32> to vector<8x1xf32>
      %42 = vector.shape_cast %39 : vector<8x1xf32> to vector<1x8x1xf32>
      tpu.vector_store %arg4[%c0_25, %c0_26, %c0_27], %42 {strides = array<i32>} : memref<1x8x3xf32, #tpu.memory_space<vmem>>, vector<1x8x1xf32>,
      %c0_28 = arith.constant 0 : index
      %c0_29 = arith.constant 0 : index
      %43 = vector.load %arg6[%c0_28, %c0_29] : memref<8x128xf32, #tpu.memory_space<vmem>>, vector<8x128xf32>
      %cst_30 = arith.constant dense<0.000000e+00> : vector<8xf32>
      %44 = vector.multi_reduction <add>, %43, %cst_30 [1] : vector<8x128xf32> to vector<8xf32>
      %45 = vector.shape_cast %44 : vector<8xf32> to vector<8x1xf32>
      %c0_31 = arith.constant 0 : index
      %c0_32 = arith.constant 0 : index
      %c1 = arith.constant 1 : index
      %46 = vector.load %arg4[%c0_31, %c0_32, %c1] : memref<1x8x3xf32, #tpu.memory_space<vmem>>, vector<1x8x1xf32>
      %47 = vector.shape_cast %46 : vector<1x8x1xf32> to vector<8x1xf32>
      %48 = vector.shape_cast %45 : vector<8x1xf32> to vector<1x8x1xf32>
      tpu.vector_store %arg4[%c0_31, %c0_32, %c1], %48 {strides = array<i32>} : memref<1x8x3xf32, #tpu.memory_space<vmem>>, vector<1x8x1xf32>,
      %c0_33 = arith.constant 0 : index
      %c0_34 = arith.constant 0 : index
      %49 = vector.load %arg7[%c0_33, %c0_34] : memref<8x128xf32, #tpu.memory_space<vmem>>, vector<8x128xf32>
      %cst_35 = arith.constant dense<0.000000e+00> : vector<8xf32>
      %50 = vector.multi_reduction <add>, %49, %cst_35 [1] : vector<8x128xf32> to vector<8xf32>
      %51 = vector.shape_cast %50 : vector<8xf32> to vector<8x1xf32>
      %c0_36 = arith.constant 0 : index
      %c0_37 = arith.constant 0 : index
      %c2 = arith.constant 2 : index
      %52 = vector.load %arg4[%c0_36, %c0_37, %c2] : memref<1x8x3xf32, #tpu.memory_space<vmem>>, vector<1x8x1xf32>
      %53 = vector.shape_cast %52 : vector<1x8x1xf32> to vector<8x1xf32>
      %54 = vector.shape_cast %51 : vector<8x1xf32> to vector<1x8x1xf32>
      tpu.vector_store %arg4[%c0_36, %c0_37, %c2], %54 {strides = array<i32>} : memref<1x8x3xf32, #tpu.memory_space<vmem>>, vector<1x8x1xf32>,
    } else {
    }
    return
  }
  func.func @transform_0(%arg0: i32, %arg1: i32) -> (i32, i32) {
    %c1_i32 = arith.constant 1 : i32
    %0 = arith.muli %arg0, %c1_i32 : i32
    %1 = arith.addi %0, %arg1 : i32
    %c1_i32_0 = arith.constant 1 : i32
    %2 = arith.minsi %1, %c1_i32_0 : i32
    %c0_i32 = arith.constant 0 : i32
    %c0_i32_1 = arith.constant 0 : i32
    return %c0_i32, %2 : i32, i32
  }
  func.func @transform_1(%arg0: i32, %arg1: i32) -> (i32, i32) {
    %c1_i32 = arith.constant 1 : i32
    %0 = arith.muli %arg0, %c1_i32 : i32
    %1 = arith.addi %0, %arg1 : i32
    %c1_i32_0 = arith.constant 1 : i32
    %2 = arith.minsi %1, %c1_i32_0 : i32
    %c0_i32 = arith.constant 0 : i32
    %c0_i32_1 = arith.constant 0 : i32
    return %c0_i32, %2 : i32, i32
  }
  func.func @transform_2(%arg0: i32, %arg1: i32) -> (i32, i32, i32) {
    %c0_i32 = arith.constant 0 : i32
    %c0_i32_0 = arith.constant 0 : i32
    %c0_i32_1 = arith.constant 0 : i32
    return %arg0, %c0_i32, %c0_i32_0 : i32, i32, i32
  }
}

</mosaic_0001>

<bundles_post_ra>
// kernel: tpu_custom_call.1
= control target key start
LH: loop header
LB: loop body
LE: loop exit
PB: predicated region body
PF: predicated region fallthrough
CT: control target
= control target key end

     0   :  { %7 = vsyncpa [#allocation6], 0  ;;  %s713_s0 = inlined_call_operand.hbm [shape: f32[8,256], index: 0, kind: input, shape index: {}]   ;;  %s714_s1 = inlined_call_operand.hbm [shape: f32[8,256], index: 1, kind: input, shape index: {}]   ;;  %s715_s2 = inlined_call_operand.vmem [shape: f32[2,8,3], index: 2, kind: output, shape index: {}]  }
   0x1   :  { %9 = vsyncpa [#allocation6 + $0x1], 0 }
   0x2   :  { %10 = vsyncpa [#allocation8], 0 }
   0x3   :  { %12 = vsyncpa [#allocation8 + $0x1], 0  ;;  %s617_s9 = smov 0   ;;  %s619_s10 = smov 0  }
   0x4   :  { %s621_s11 = smov 0   ;;  %s623_s12 = smov 0  }
   0x5   :  { %s625_s13 = smov 0   ;;  %s627_s14 = smov 0  }
   0x6 LB: > { %s406_s15 = sadd.s32 4294967295, %s600_s14   ;;  %s30_s16 = sadd.s32 1, %s596_s13  ;;  %s600_s14 = sphi %s627_s14, %s18_s14   ;;  %s596_s13 = sphi %s625_s13, %s722_s13   ;;  %s592_s12 = sphi %s623_s12, %s721_s12   ;;  %s588_s11 = sphi %s621_s11, %s720_s11   ;;  %s584_s10 = sphi %s619_s10, %s719_s10   ;;  %s580_s9 = sphi %s617_s9, %s718_s9  }
   0x7   : > { %p32_p0 = scmp.ge.s32.totalorder %s30_s16, 2  ;;  %p35_p1 = scmp.lt.s32.totalorder %s596_s13, 1 }
   0x8   : > { %s43_s17 = sadd.s32 1, %s588_s11  ;;  %p50_p2 = scmp.ne.s32.totalorder %s588_s11, %s584_s10 }
   0x9   : > { %s724_s16 = smov (%p32_p0, %s30_s16), 0  ;;  %p51_p4 = scmp.eq.s32.totalorder %s600_s14, 0 }
   0xa   : > { %s36_s18 = scalar_select %p35_p1, %s596_s13, 1 }
   0xb   : > { %p38_p3 = scmp.lt.s32.totalorder %s724_s16, 1  ;;  %p56_p5 = scmp.ne.s32.totalorder %s584_s10, %s580_s9 }
   0xc   : > { %p57_p6 = scmp.eq.s32.totalorder %s406_s15, 0  ;;  %p658_p7 = por %p51_p4, %p50_p2 }
   0xd   : > { %s39_s19 = scalar_select %p38_p3, %s724_s16, 1 }
   0xe   : > { %p662_p8 = por %p57_p6, %p56_p5  ;;  %p431_p10 = scmp.lt.s32.totalorder %s600_s14, 2 }
   0xf   : > { %s40_s22 = ssub.s32 %s36_s18, %s39_s19  ;;  %s138_s23 = sand.u32 1, %s588_s11  }
  0x10   : > { %p41_p9 = scmp.eq.s32.totalorder %s40_s22, 0  ;;  %s411_s24 = sshll.u32 %s36_s18, 3 }
  0x11   : > { %s410_s26 = sshll.u32 %s138_s23, 3  ;;  %s149_s29 = scalar_lea.hbm %s713_s0, %s411_s24 }
  0x12   : > { %s669_s25 = scalar_select %p41_p9, %s588_s11, %s43_s17  }
  0x13   : > { %s151_s30 = sshll.u32 %s149_s29, 4  ;;  %s142_s3 = scalar_lea.vmem [#allocation5], %s410_s26  ;;  %s152_s30 = int_to_ptr.hbm [resolvable:$true] %s151_s30 }
  0x14   : > { %s153_s4 = sshll.u32 %s142_s3, 4  ;;  %p425_p11 = pnand %p431_p10, %p658_p7  ;;  %s154_s4 = int_to_ptr.vmem [resolvable:$true] %s153_s4 }
  0x15   : > { %p414_p12 = scmp.ge.s32.totalorder %s600_s14, 1  ;;  %p180_p13 = scmp.lt.s32.totalorder %s600_s14, 3 }
  0x16   : > { %s139_s5 = scalar_lea.sflag [#allocation6], %s138_s23  ;;  %s171_s8 = scalar_lea.hbm %s714_s1, %s411_s24 }
  0x17   : > { %427 = dma.hbm_to_vmem [thread:$0]  (!%p425_p11), %s152_s30, 128, %s154_s4, %s139_s5  }
  0x18   : > { %p181_p0 = pnand %p414_p12, %p180_p13  ;;  %s173_s9 = sshll.u32 %s171_s8, 4  ;;  %s174_s9 = int_to_ptr.hbm [resolvable:$true] %s173_s9 }
  0x19   : > { %s164_s15 = scalar_lea.vmem [#allocation7], %s410_s26  ;;  %s161_s18 = scalar_lea.sflag [#allocation8], %s138_s23 }
  0x1a   : > { %s175_s17 = sshll.u32 %s164_s15, 4  ;;  %184 = sbr.rel (%p181_p0) target bundleno = 198 (0xc6), region = 28  ;;  %s176_s17 = int_to_ptr.vmem [resolvable:$true] %s175_s17 }
  0x1b   : > { %430 = dma.hbm_to_vmem [thread:$0]  (!%p425_p11), %s174_s9, 128, %s176_s17, %s161_s18  }
  0x1c   : > { %s186_s19 = sand.u32 (!%p181_p0), 1, %s584_s10  }
  0x1d   : > { %s415_s20 = sshll.u32 (!%p181_p0), %s186_s19, 3  ;;  %s187_s22 = scalar_lea.sflag (!%p181_p0), [#allocation6], %s186_s19 }
  0x1e   : > { %s190_s27 = scalar_lea.vmem (!%p181_p0), [#allocation5], %s415_s20 }
  0x1f   : > { %571 = dma.done.wait (%p662_p8), %s187_s22, 128  }
  0x20   : > { %573 = vsyncadd (%p662_p8), %s187_s22, 4294967168  ;;  %s197_s24 = scalar_lea.sflag [#allocation8], %s186_s19  ;;  %s200_s26 = scalar_lea.vmem [#allocation7], %s415_s20 }
  0x21   : > { %575 = dma.done.wait (%p662_p8), %s197_s24, 128  }
  0x22   : > { %577 = vsyncadd (%p662_p8), %s197_s24, 4294967168  ;;  %v243_v0 = vld [vmem:[%s190_s27] sm:$0xff]  ;;  %v244_v7 = vld [vmem:[%s200_s26] sm:$0xff]  ;;  %p232_p1 = scmp.lt.s32.totalorder %s592_s12, 1  ;;  %vm298_vm6 = vcmask 7168   ;;  %vm303_vm7 = vcmask 15368  }
  0x23   : > { %v245_v1 = vand.u32 2147483647, %v243_v0  ;;  %v268_v9 = vmax.f32 %v243_v0, 0.0  ;;  %v269_v10 = vmul.f32 %v244_v7, %v243_v0  ;;  %vm265_vm5 = vcmp.ge.f32.partialorder %v243_v0, 0.0 }
  0x24   : > { %s726_s12 = smov (!%p232_p1, %s592_s12), 1  ;;  %vm308_vm8 = vcmask 23568  }
  0x25   : > { %v246_v2 = vsub.f32 0.0, %v245_v1  ;;  %v270_v16 = vsub.f32 %v268_v9, %v269_v10  ;;  %s417_s21 = sshll.u32 %s726_s12, 3 }
  0x26   : > { %s235_s29 = scalar_lea.vmem %s715_s2, %s417_s21 }
  0x27   : > { %v247_v3 = vmul.f32 1.442695, %v246_v2 }
  0x29   : > { %480 = vpow2.f32 %v247_v3 }
  0x2f   : > { %v481_v4 = vpop.eup %480 }
  0x30   : > { %v249_v5 = vadd.f32 1.0, %v481_v4  ;;  %v274_v6 = vmul.f32 -0.5, %v481_v4  ;;  %v277_v11 = vand.u32 2147483647, %v481_v4 }
  0x32   : > { %482 = vrcp.f32 %v249_v5  ;;  %v275_v8 = vadd.f32 1.0, %v274_v6  ;;  %vm278_vm0 = vcmp.lt.f32.partialorder %v277_v11, 0.0004427343  ;;  %v261_v17 = vand.u32 2147483648, %v249_v5 }
  0x33   : > { %484 = vlog2.f32 %v249_v5  ;;  %vm255_vm1 = vweird.f32 %v249_v5  ;;  %v259_v20 = vand.u32 2147483647, %v249_v5 }
  0x34   : > { %v276_v13 = vmul.f32 %v481_v4, %v275_v8  ;;  %v262_v24 = vor.u32 1.1754944e-38, %v261_v17 }
  0x35   : > { %vm260_vm4 = vcmp.eq.f32.partialorder %v259_v20, 8.507059e+37 }
  0x38   : > { %v483_v12 = vpop.eup %482 }
  0x39   : > { %v485_v14 = vpop.eup %484  ;;  %v251_v15 = vmul.f32 %v483_v12, %v249_v5  ;;  %vm256_vm2 = vweird.f32 %v483_v12 }
  0x3a   : > { %v273_v18 = vmul.f32 0.6931472, %v485_v14  ;;  %vm257_vm3 = vmor %vm255_vm1, %vm256_vm2 }
  0x3b   : > { %v252_v19 = vsub.f32 1.0, %v251_v15 }
  0x3c   : > { %v279_v21 = vsel %vm278_vm0, %v276_v13, %v273_v18 }
  0x3d   : > { %v253_v22 = vmul.f32 %v483_v12, %v252_v19  ;;  %v280_v23 = vadd.f32 %v279_v21, %v270_v16 }
  0x3f   : > { %v254_v25 = vadd.f32 %v483_v12, %v253_v22  ;;  %306 = vadd.xlane.f32.xlu1 %v280_v23 }
  0x41   : > { %v258_v26 = vsel %vm257_vm3, %v483_v12, %v254_v25 }
  0x42   : > { %v263_v27 = vsel %vm260_vm4, %v262_v24, %v258_v26 }
  0x43   : > { %v266_v28 = vmul.f32 %v481_v4, %v263_v27 }
  0x45   : > { %v267_v29 = vsel %vm265_vm5, %v263_v27, %v266_v28 }
  0x46   : > { %v281_v30 = vmul.f32 %v267_v29, %v244_v7  ;;  %v282_v31 = vadd.f32 %v267_v29, %v244_v7 }
  0x48   : > { %296 = vadd.xlane.f32.xlu0 %v281_v30 }
  0x50   : > { %301 = vadd.xlane.f32.xlu0 %v282_v31 }
  0xb2   : > { %v307_v33 = vpop.xlane.xlu1 %306 }
  0xbb   : > { %v297_v32 = vpop.xlane.xlu0 %296 }
  0xbc   : > { %299 = vst.msk [vmem:[%s235_s29] sm:$0xff] %vm298_vm6, %v297_v32 }
  0xc3   : > { %v302_v34 = vpop.xlane.xlu0 %301 }
  0xc4   : > { %304 = vst.msk [vmem:[%s235_s29] sm:$0xff] %vm303_vm7, %v302_v34 }
  0xc5   : > { %309 = vst.msk [vmem:[%s235_s29] sm:$0xff] %vm308_vm8, %v307_v33 }
  0xc6 PF: > { %s18_s14 = sadd.s32 1, %s600_s14   ;;  %s718_s9 = smov %s584_s10 }
  0xc7   : > { %p15_p2 = scmp.ge.s32.totalorder %s18_s14, 4   ;;  %s719_s10 = smov %s588_s11 }
  0xc8   : > { %s720_s11 = smov %s669_s25  ;;  %s721_s12 = smov %s596_s13 }
  0xc9   : > { %s722_s13 = smov %s724_s16  ;;  %17 = sbr.rel (!%p15_p2) target bundleno = 6 (0x6), region = 89 }
  0xce   :  { %329 = vsyncpa [#allocation6], 1 }
  0xcf   :  { %331 = vsyncpa [#allocation6 + $0x1], 1 }
  0xd0   :  { %332 = vsyncpa [#allocation8], 1 }
  0xd1   :  { %334 = vsyncpa [#allocation8 + $0x1], 1 }

</bundles_post_ra>
